<compile_context>
chip_gen: v5e
topology: v5e:2x2
jax: 0.10.0
libtpu: 0.0.40
codegen_flags: <defaults>
</compile_context>

<pallas_src>
import jax
import jax.numpy as jnp
from jax.experimental import pallas as pl
from jax.experimental.pallas import tpu as pltpu

_reduction_modes = ['none', 'mean', 'sum']

_LANES = 256                        # lane axis (multiple of 128)
_SUBLANES = 8                       # sublane axis (one f32 vreg row-group)
_GROUP_ELEMS = _SUBLANES * _LANES   # 2048 elements per (8, 256) group
_MAX_BLOCK_GROUPS = 512             # hard cap on groups per block (~4 MiB f32)
_VMEM_BLOCK_BUDGET = 24 * 1024 * 1024   # double-buffered block VMEM target
_VMEM_LIMIT = 32 * 1024 * 1024          # explicit scoped-VMEM limit (safe on v5e/v6e/v7x)
_SMALL_NUMEL = 16384                # below this: plain jnp (launch overhead dominates)
_NUM_SHARDS = 2                     # leading 'parallel' grid axis (v7x megacore)


# ---------------------------------------------------------------------------
# Pallas kernels (all cast to f32 in-kernel; inputs stream in native dtype)
# ---------------------------------------------------------------------------
def _l1_sum_kernel(p_ref, t_ref, acc_ref):
    @pl.when(pl.program_id(1) == 0)
    def _():
        acc_ref[...] = jnp.zeros_like(acc_ref)
    d = jnp.abs(p_ref[...].astype(jnp.float32) - t_ref[...].astype(jnp.float32))
    acc_ref[...] += jnp.sum(d, axis=0, keepdims=True)


def _l1_sum_weighted_kernel(p_ref, t_ref, w_ref, acc_ref, wacc_ref):
    @pl.when(pl.program_id(1) == 0)
    def _():
        acc_ref[...] = jnp.zeros_like(acc_ref)
        wacc_ref[...] = jnp.zeros_like(wacc_ref)
    w = w_ref[...].astype(jnp.float32)
    d = jnp.abs(p_ref[...].astype(jnp.float32) - t_ref[...].astype(jnp.float32)) * w
    acc_ref[...] += jnp.sum(d, axis=0, keepdims=True)
    wacc_ref[...] += jnp.sum(w, axis=0, keepdims=True)


def _l1_none_kernel(p_ref, t_ref, o_ref):
    d = jnp.abs(p_ref[...].astype(jnp.float32) - t_ref[...].astype(jnp.float32))
    o_ref[...] = d.astype(o_ref.dtype)


def _l1_none_weighted_kernel(p_ref, t_ref, w_ref, o_ref):
    d = jnp.abs(p_ref[...].astype(jnp.float32) - t_ref[...].astype(jnp.float32))
    o_ref[...] = (d * w_ref[...].astype(jnp.float32)).astype(o_ref.dtype)


# ---------------------------------------------------------------------------
# Tiling helpers
# ---------------------------------------------------------------------------
def _block_group_cap(bytes_per_elem_all_streams):
    """Largest groups-per-block such that all double-buffered block streams fit
    in the VMEM budget."""
    per_group = 2 * _GROUP_ELEMS * bytes_per_elem_all_streams
    return int(max(8, min(_MAX_BLOCK_GROUPS, _VMEM_BLOCK_BUDGET // per_group)))


def _largest_divisor(n, cap, floor):
    """Largest divisor of n that is <= cap and >= floor, else None."""
    for b in range(min(cap, n), floor - 1, -1):
        if n % b == 0:
            return b
    return None


def _jnp_l1_sums(p, t, w):
    p32 = p.astype(jnp.float32)
    t32 = t.astype(jnp.float32)
    d = jnp.abs(p32 - t32)
    if w is None:
        return jnp.sum(d), None
    w32 = w.astype(jnp.float32)
    return jnp.sum(d * w32), jnp.sum(w32)


def _l1_loss_jnp(pred, target, weight, reduction, out_dtype):
    d = jnp.abs(pred.astype(jnp.float32) - target.astype(jnp.float32))
    if weight is not None:
        w = weight.astype(jnp.float32)
        if reduction == 'none':
            return (d * w).astype(out_dtype)
        if reduction == 'sum':
            return jnp.sum(d * w).astype(out_dtype)
        return (jnp.sum(d * w) / jnp.sum(w)).astype(out_dtype)
    if reduction == 'none':
        return d.astype(out_dtype)
    if reduction == 'sum':
        return jnp.sum(d).astype(out_dtype)
    return jnp.mean(d).astype(out_dtype)


# ---------------------------------------------------------------------------
# Reduction ('mean' / 'sum') path: accumulator kernel + tiny jnp finish
# ---------------------------------------------------------------------------
def _l1_sum_pallas(pred, target, weight):
    numel = pred.size
    flat_p = pred.reshape(-1)
    flat_t = target.reshape(-1)
    flat_w = weight.reshape(-1) if weight is not None else None

    n_groups = numel // _GROUP_ELEMS
    main_len = n_groups * _GROUP_ELEMS
    tail = numel - main_len

    extra_s = jnp.float32(0.0)
    extra_ws = jnp.float32(0.0)

    if tail:
        # <2048-element tail finished with a tiny jnp reduction.  NOTE: the
        # prefix slice below costs one extra copy of the inputs for ragged
        # sizes; sizes that are exact multiples of 2048 are fully copy-free.
        ts, tws = _jnp_l1_sums(flat_p[main_len:], flat_t[main_len:],
                               flat_w[main_len:] if flat_w is not None else None)
        extra_s = extra_s + ts
        if tws is not None:
            extra_ws = extra_ws + tws
        flat_p = flat_p[:main_len]
        flat_t = flat_t[:main_len]
        if flat_w is not None:
            flat_w = flat_w[:main_len]

    p3 = flat_p.reshape(n_groups, _SUBLANES, _LANES)
    t3 = flat_t.reshape(n_groups, _SUBLANES, _LANES)
    w3 = flat_w.reshape(n_groups, _SUBLANES, _LANES) if flat_w is not None else None

    bytes_all = (jnp.dtype(pred.dtype).itemsize + jnp.dtype(target.dtype).itemsize
                 + (jnp.dtype(weight.dtype).itemsize if weight is not None else 0))
    cap = _block_group_cap(bytes_all)

    n_shards = _NUM_SHARDS if n_groups >= 2 * _NUM_SHARDS else 1
    steps = pl.cdiv(n_groups, n_shards * cap)
    blk_g = n_groups // (n_shards * steps)
    n_cov = n_shards * steps * blk_g

    if n_cov < n_groups:
        # A handful of leftover whole groups (< n_shards*steps, i.e. <~0.3% of
        # the data) finished in jnp; keeps the kernel grid exactly tiled.
        ls, lws = _jnp_l1_sums(p3[n_cov:], t3[n_cov:],
                               w3[n_cov:] if w3 is not None else None)
        extra_s = extra_s + ls
        if lws is not None:
            extra_ws = extra_ws + lws

    in_spec = pl.BlockSpec((blk_g, _SUBLANES, _LANES),
                           lambda s, j: (s * steps + j, 0, 0))
    acc_spec = pl.BlockSpec((1, _SUBLANES, _LANES), lambda s, j: (s, 0, 0))
    acc_shape = jax.ShapeDtypeStruct((n_shards, _SUBLANES, _LANES), jnp.float32)
    cparams = pltpu.CompilerParams(
        dimension_semantics=("parallel", "arbitrary"),
        vmem_limit_bytes=_VMEM_LIMIT)

    if weight is None:
        acc = pl.pallas_call(
            _l1_sum_kernel,
            out_shape=acc_shape,
            grid=(n_shards, steps),
            in_specs=[in_spec, in_spec],
            out_specs=acc_spec,
            compiler_params=cparams,
        )(p3, t3)
        return jnp.sum(acc) + extra_s, None

    acc, wacc = pl.pallas_call(
        _l1_sum_weighted_kernel,
        out_shape=(acc_shape, acc_shape),
        grid=(n_shards, steps),
        in_specs=[in_spec, in_spec, in_spec],
        out_specs=(acc_spec, acc_spec),
        compiler_params=cparams,
    )(p3, t3, w3)
    return jnp.sum(acc) + extra_s, jnp.sum(wacc) + extra_ws


# ---------------------------------------------------------------------------
# reduction='none' path: elementwise streaming kernel
# ---------------------------------------------------------------------------
def _l1_none_pallas(pred, target, weight, out_dtype):
    numel = pred.size
    shape = pred.shape

    flat_p = pred.reshape(-1)
    flat_t = target.reshape(-1)
    flat_w = weight.reshape(-1) if weight is not None else None

    bytes_all = (jnp.dtype(pred.dtype).itemsize + jnp.dtype(target.dtype).itemsize
                 + (jnp.dtype(weight.dtype).itemsize if weight is not None else 0)
                 + jnp.dtype(out_dtype).itemsize)
    cap = _block_group_cap(bytes_all)

    n_groups_exact = numel // _GROUP_ELEMS
    tail = numel - n_groups_exact * _GROUP_ELEMS

    blk_g = None
    if tail == 0 and n_groups_exact > 0:
        blk_g = _largest_divisor(n_groups_exact, cap, min(32, n_groups_exact))

    if blk_g is not None:
        # Fully copy-free: flat size is a whole number of blocks.
        n_g = n_groups_exact
        p3 = flat_p.reshape(n_g, _SUBLANES, _LANES)
        t3 = flat_t.reshape(n_g, _SUBLANES, _LANES)
        w3 = flat_w.reshape(n_g, _SUBLANES, _LANES) if flat_w is not None else None
        padded = False
    else:
        # Ragged / awkward factorization: pad once to a whole number of blocks
        # (one extra HBM pass; only hit for odd sizes).
        n_total = pl.cdiv(numel, _GROUP_ELEMS)
        blk_g = min(cap, n_total)
        n_g = pl.cdiv(n_total, blk_g) * blk_g
        total = n_g * _GROUP_ELEMS
        flat_p = jnp.pad(flat_p, (0, total - numel))
        flat_t = jnp.pad(flat_t, (0, total - numel))
        p3 = flat_p.reshape(n_g, _SUBLANES, _LANES)
        t3 = flat_t.reshape(n_g, _SUBLANES, _LANES)
        if flat_w is not None:
            flat_w = jnp.pad(flat_w, (0, total - numel))
            w3 = flat_w.reshape(n_g, _SUBLANES, _LANES)
        else:
            w3 = None
        padded = True

    grid = n_g // blk_g
    spec = pl.BlockSpec((blk_g, _SUBLANES, _LANES), lambda i: (i, 0, 0))
    out_shape = jax.ShapeDtypeStruct((n_g, _SUBLANES, _LANES), out_dtype)
    cparams = pltpu.CompilerParams(dimension_semantics=("parallel",),
                                   vmem_limit_bytes=_VMEM_LIMIT)

    if w3 is None:
        out3 = pl.pallas_call(
            _l1_none_kernel,
            out_shape=out_shape,
            grid=(grid,),
            in_specs=[spec, spec],
            out_specs=spec,
            compiler_params=cparams,
        )(p3, t3)
    else:
        out3 = pl.pallas_call(
            _l1_none_weighted_kernel,
            out_shape=out_shape,
            grid=(grid,),
            in_specs=[spec, spec, spec],
            out_specs=spec,
            compiler_params=cparams,
        )(p3, t3, w3)

    flat_out = out3.reshape(-1)
    if padded:
        flat_out = flat_out[:numel]
    return flat_out.reshape(shape)


# ---------------------------------------------------------------------------
# basicsr `weighted_loss` semantics for l1_loss + the L1Loss module
# ---------------------------------------------------------------------------
def l1_loss(pred, target, weight=None, reduction='mean'):
    if reduction not in _reduction_modes:
        raise ValueError(
            f'Unsupported reduction mode: {reduction}. Supported ones are: {_reduction_modes}')

    if weight is not None and weight.shape != tuple(pred.shape):
        # basicsr allows a channel-1 weight; only this (rarer) case materializes
        # the broadcast.  A same-shape weight streams straight into the kernel.
        weight = jnp.broadcast_to(weight, pred.shape)

    if weight is None:
        out_dtype = jnp.result_type(pred.dtype, target.dtype)
    else:
        out_dtype = jnp.result_type(pred.dtype, target.dtype, weight.dtype)

    numel = pred.size
    if numel < _SMALL_NUMEL:
        return _l1_loss_jnp(pred, target, weight, reduction, out_dtype)

    if reduction == 'none':
        return _l1_none_pallas(pred, target, weight, out_dtype)

    s, ws = _l1_sum_pallas(pred, target, weight)
    if reduction == 'sum':
        return s.astype(out_dtype)
    # reduction == 'mean'
    if weight is None:
        return (s / numel).astype(out_dtype)
    # mean over weight region: sum(|d| * w) / sum(broadcast(w))
    return (s / ws).astype(out_dtype)


class L1Loss:
    """L1 (MAE) loss, Pallas-TPU backed.

    Args:
        loss_weight (float): Loss weight for L1 loss. Default: 1.0.
        reduction (str): 'none' | 'mean' | 'sum'. Default: 'mean'.
    """

    def __init__(self, loss_weight=1.0, reduction='mean'):
        if reduction not in _reduction_modes:
            raise ValueError(
                f'Unsupported reduction mode: {reduction}. Supported ones are: {_reduction_modes}')
        self.loss_weight = loss_weight
        self.reduction = reduction

    def __call__(self, pred, target, weight=None, **kwargs):
        return self.loss_weight * l1_loss(pred, target, weight, reduction=self.reduction)


# ---------------------------------------------------------------------------
# Demo / self-check
# ---------------------------------------------------------------------------
if __name__ == "__main__":
    key = jax.random.PRNGKey(0)
    kp, kt, kw, kw1, kr = jax.random.split(key, 5)

    # Shapes chosen small but above the jnp-fallback threshold so the Pallas
    # kernels actually run.
    shape = (2, 3, 64, 64)          # 24576 elements = 12 (8,256) groups
    pred = jax.random.uniform(kp, shape, dtype=jnp.float32)
    target = jax.random.uniform(kt, shape, dtype=jnp.float32)
    weight = jax.random.uniform(kw, shape, dtype=jnp.float32)
    weight_c1 = jax.random.uniform(kw1, (2, 1, 64, 64), dtype=jnp.float32)

    mean_fn = jax.jit(lambda p, t: L1Loss(loss_weight=1.0, reduction='mean')(p, t))
    sum_fn = jax.jit(lambda p, t: L1Loss(loss_weight=0.5, reduction='sum')(p, t))
    none_fn = jax.jit(lambda p, t: L1Loss(loss_weight=2.0, reduction='none')(p, t))
    wmean_fn = jax.jit(lambda p, t, w: L1Loss(loss_weight=1.0, reduction='mean')(p, t, w))

    loss_mean = mean_fn(pred, target)
    loss_sum = sum_fn(pred, target)
    loss_none = none_fn(pred, target)
    loss_wmean = wmean_fn(pred, target, weight)
    loss_wmean_c1 = wmean_fn(pred, target, weight_c1)

    # Ragged size (not a multiple of 2048): exercises tail + leftover handling.
    rshape = (2, 3, 53, 61)         # 19398 elements
    rp = jax.random.uniform(kr, rshape, dtype=jnp.float32)
    rt = jax.random.uniform(jax.random.fold_in(kr, 1), rshape, dtype=jnp.float32)
    loss_rmean = mean_fn(rp, rt)
    loss_rnone = none_fn(rp, rt)

    # bf16 inputs: streamed in native dtype, cast in-kernel.
    pred_bf = pred.astype(jnp.bfloat16)
    target_bf = target.astype(jnp.bfloat16)
    loss_bf = mean_fn(pred_bf, target_bf)

    jax.block_until_ready((loss_mean, loss_sum, loss_none, loss_wmean,
                           loss_wmean_c1, loss_rmean, loss_rnone, loss_bf))

    # References.
    d = jnp.abs(pred - target)
    wb1 = jnp.broadcast_to(weight_c1, shape)
    ref_mean = jnp.mean(d)
    ref_sum = 0.5 * jnp.sum(d)
    ref_none = 2.0 * d
    ref_wmean = jnp.sum(d * weight) / jnp.sum(weight)
    ref_wmean_c1 = jnp.sum(d * wb1) / jnp.sum(wb1)
    rd = jnp.abs(rp - rt)
    ref_rmean = jnp.mean(rd)
    ref_rnone = 2.0 * rd
    ref_bf = jnp.mean(jnp.abs(pred_bf.astype(jnp.float32) - target_bf.astype(jnp.float32)))

    assert loss_mean.shape == ()
    assert jnp.allclose(loss_mean, ref_mean, rtol=1e-5, atol=1e-6)
    assert jnp.allclose(loss_sum, ref_sum, rtol=1e-5, atol=1e-3)
    assert loss_none.shape == shape and loss_none.dtype == pred.dtype
    assert jnp.allclose(loss_none, ref_none, rtol=1e-6, atol=1e-6)
    assert jnp.allclose(loss_wmean, ref_wmean, rtol=1e-5, atol=1e-6)
    assert jnp.allclose(loss_wmean_c1, ref_wmean_c1, rtol=1e-5, atol=1e-6)
    assert jnp.allclose(loss_rmean, ref_rmean, rtol=1e-5, atol=1e-6)
    assert loss_rnone.shape == rshape
    assert jnp.allclose(loss_rnone, ref_rnone, rtol=1e-6, atol=1e-6)
    assert loss_bf.dtype == jnp.bfloat16
    assert jnp.allclose(loss_bf.astype(jnp.float32), ref_bf, rtol=2e-2, atol=2e-2)

    print("KERNEL_OK")
</pallas_src>

<mosaic_0001>
module attributes {stable_mosaic.version = 11 : i64} {
  func.func @_l1_sum_kernel(%arg0: i32, %arg1: i32, %arg2: memref<6x8x256xf32, #tpu.memory_space<vmem>>, %arg3: memref<6x8x256xf32, #tpu.memory_space<vmem>>, %arg4: memref<1x8x256xf32, #tpu.memory_space<vmem>>) attributes {dimension_semantics = [#tpu.dimension_semantics<parallel>, #tpu.dimension_semantics<arbitrary>], iteration_bounds = array<i64: 2, 1>, scalar_prefetch = 0 : i64, scratch_operands = 0 : i64, tpu.core_type = #tpu.core_type<tc>, window_params = [{transform_indices = @transform_0, window_bounds = array<i64: 6, 8, 256>}, {transform_indices = @transform_1, window_bounds = array<i64: 6, 8, 256>}, {transform_indices = @transform_2, window_bounds = array<i64: 1, 8, 256>}]} {
    %c0_i32 = arith.constant 0 : i32
    %0 = arith.cmpi eq, %arg1, %c0_i32 : i32
    %1 = arith.extui %0 : i1 to i32
    %c0_i32_0 = arith.constant 0 : i32
    %2 = arith.cmpi ne, %1, %c0_i32_0 : i32
    scf.if %2 {
      %cst_12 = arith.constant 0.000000e+00 : f32
      %12 = vector.broadcast %cst_12 : f32 to vector<1x8x256xf32>
      %c0_13 = arith.constant 0 : index
      %c0_14 = arith.constant 0 : index
      %c0_15 = arith.constant 0 : index
      %13 = vector.load %arg4[%c0_13, %c0_14, %c0_15] : memref<1x8x256xf32, #tpu.memory_space<vmem>>, vector<1x8x256xf32>
      tpu.vector_store %arg4[%c0_13, %c0_14, %c0_15], %12 {strides = array<i32>} : memref<1x8x256xf32, #tpu.memory_space<vmem>>, vector<1x8x256xf32>,
    } else {
    }
    %c0 = arith.constant 0 : index
    %c0_1 = arith.constant 0 : index
    %c0_2 = arith.constant 0 : index
    %3 = vector.load %arg2[%c0, %c0_1, %c0_2] : memref<6x8x256xf32, #tpu.memory_space<vmem>>, vector<6x8x256xf32>
    %c0_3 = arith.constant 0 : index
    %c0_4 = arith.constant 0 : index
    %c0_5 = arith.constant 0 : index
    %4 = vector.load %arg3[%c0_3, %c0_4, %c0_5] : memref<6x8x256xf32, #tpu.memory_space<vmem>>, vector<6x8x256xf32>
    %5 = arith.subf %3, %4 : vector<6x8x256xf32>
    %6 = math.absf %5 : vector<6x8x256xf32>
    %c0_6 = arith.constant 0 : index
    %c0_7 = arith.constant 0 : index
    %c0_8 = arith.constant 0 : index
    %7 = vector.load %arg4[%c0_6, %c0_7, %c0_8] : memref<1x8x256xf32, #tpu.memory_space<vmem>>, vector<1x8x256xf32>
    %cst = arith.constant dense<0.000000e+00> : vector<8x256xf32>
    %8 = vector.multi_reduction <add>, %6, %cst [0] : vector<6x8x256xf32> to vector<8x256xf32>
    %9 = vector.shape_cast %8 : vector<8x256xf32> to vector<1x8x256xf32>
    %10 = arith.addf %7, %9 : vector<1x8x256xf32>
    %c0_9 = arith.constant 0 : index
    %c0_10 = arith.constant 0 : index
    %c0_11 = arith.constant 0 : index
    %11 = vector.load %arg4[%c0_9, %c0_10, %c0_11] : memref<1x8x256xf32, #tpu.memory_space<vmem>>, vector<1x8x256xf32>
    tpu.vector_store %arg4[%c0_9, %c0_10, %c0_11], %10 {strides = array<i32>} : memref<1x8x256xf32, #tpu.memory_space<vmem>>, vector<1x8x256xf32>,
    return
  }
  func.func @transform_0(%arg0: i32, %arg1: i32) -> (i32, i32, i32) {
    %c1_i32 = arith.constant 1 : i32
    %0 = arith.muli %arg0, %c1_i32 : i32
    %1 = arith.addi %0, %arg1 : i32
    %c0_i32 = arith.constant 0 : i32
    %c0_i32_0 = arith.constant 0 : i32
    %c0_i32_1 = arith.constant 0 : i32
    return %1, %c0_i32, %c0_i32_0 : i32, i32, i32
  }
  func.func @transform_1(%arg0: i32, %arg1: i32) -> (i32, i32, i32) {
    %c1_i32 = arith.constant 1 : i32
    %0 = arith.muli %arg0, %c1_i32 : i32
    %1 = arith.addi %0, %arg1 : i32
    %c0_i32 = arith.constant 0 : i32
    %c0_i32_0 = arith.constant 0 : i32
    %c0_i32_1 = arith.constant 0 : i32
    return %1, %c0_i32, %c0_i32_0 : i32, i32, i32
  }
  func.func @transform_2(%arg0: i32, %arg1: i32) -> (i32, i32, i32) {
    %c0_i32 = arith.constant 0 : i32
    %c0_i32_0 = arith.constant 0 : i32
    %c0_i32_1 = arith.constant 0 : i32
    return %arg0, %c0_i32, %c0_i32_0 : i32, i32, i32
  }
}

</mosaic_0001>

<bundles_post_ra>
// kernel: _lambda_.1
= control target key start
LH: loop header
LB: loop body
LE: loop exit
PB: predicated region body
PF: predicated region fallthrough
CT: control target
= control target key end

     0   :  { %s425_s9 = smov 0   ;;  %s427_s10 = smov 0   ;;  %s496_s0 = inlined_call_operand.vmem [shape: f32[12,8,256], index: 0, kind: input, shape index: {}]   ;;  %s497_s1 = inlined_call_operand.vmem [shape: f32[12,8,256], index: 1, kind: input, shape index: {}]   ;;  %s498_s2 = inlined_call_operand.vmem [shape: f32[2,8,256], index: 2, kind: output, shape index: {}]  }
   0x1   :  { %s429_s11 = smov 0  }
   0x2 LB: > { %s24_s12 = sadd.s32 1, %s404_s10  ;;  %p349_p0 = scmp.ge.s32.totalorder %s408_s11, 1  ;;  %s408_s11 = sphi %s429_s11, %s12_s11   ;;  %s404_s10 = sphi %s427_s10, %s500_s10   ;;  %s400_s9 = sphi %s425_s9, %s499_s9  }
   0x3   : > { %p26_p1 = scmp.ge.s32.totalorder %s24_s12, 2  ;;  %p146_p2 = scmp.lt.s32.totalorder %s408_s11, 3 }
   0x5   : > { %s502_s12 = smov (%p26_p1, %s24_s12), 0  ;;  %p147_p3 = pnand %p349_p0, %p146_p2 }
   0x6   : > { %s178_s13 = smul.u32 (!%p147_p3), 6, %s400_s9  ;;  %p195_p5 = scmp.lt.s32.totalorder (!%p147_p3), %s400_s9, 1 }
   0x7   : > { %150 = sbr.rel (%p147_p3) target bundleno = 37 (0x25), region = 28 }
   0x8   : > { %p179_p4 = scmp.lt.s32.totalorder (!%p147_p3), %s178_s13, 11 }
   0xc   : > { %s504_s13 = smov (!%p179_p4, %s178_s13), 11  ;;  %s506_s9 = smov (!%p195_p5, %s400_s9), 1 }
   0xd   : > { %s358_s14 = sshll.u32 %s504_s13, 4  ;;  %s360_s21 = sshll.u32 %s506_s9, 4 }
   0xe   : > { %s449_s17 = scalar_lea.vmem %s496_s0, %s358_s14  ;;  %s454_s20 = scalar_lea.vmem %s497_s1, %s358_s14 }
   0xf   : > { %v206_v0 = vld [vmem:[%s449_s17] sm:$0xff]  ;;  %v208_v1 = vld [vmem:[%s449_s17 + $0x10] sm:$0xff]  ;;  %v207_v21 = vld [vmem:[%s449_s17 + $0x8] sm:$0xff]  ;;  %s199_s24 = scalar_lea.vmem %s498_s2, %s360_s21 }
  0x10   : > { %v210_v2 = vld [vmem:[%s449_s17 + $0x20] sm:$0xff]  ;;  %v212_v3 = vld [vmem:[%s449_s17 + $0x30] sm:$0xff]  ;;  %v209_v22 = vld [vmem:[%s449_s17 + $0x18] sm:$0xff] }
  0x11   : > { %v214_v4 = vld [vmem:[%s449_s17 + $0x40] sm:$0xff]  ;;  %v216_v5 = vld [vmem:[%s449_s17 + $0x50] sm:$0xff]  ;;  %v211_v23 = vld [vmem:[%s449_s17 + $0x28] sm:$0xff] }
  0x12   : > { %v218_v6 = vld [vmem:[%s454_s20] sm:$0xff]  ;;  %v220_v7 = vld [vmem:[%s454_s20 + $0x10] sm:$0xff]  ;;  %v213_v26 = vld [vmem:[%s449_s17 + $0x38] sm:$0xff] }
  0x13   : > { %v222_v8 = vld [vmem:[%s454_s20 + $0x20] sm:$0xff]  ;;  %v224_v9 = vld [vmem:[%s454_s20 + $0x30] sm:$0xff]  ;;  %v230_v12 = vsub.f32 %v206_v0, %v218_v6  ;;  %v232_v13 = vsub.f32 %v208_v1, %v220_v7  ;;  %v215_v27 = vld [vmem:[%s449_s17 + $0x48] sm:$0xff] }
  0x14   : > { %v226_v10 = vld [vmem:[%s454_s20 + $0x40] sm:$0xff]  ;;  %v228_v11 = vld [vmem:[%s454_s20 + $0x50] sm:$0xff]  ;;  %v234_v14 = vsub.f32 %v210_v2, %v222_v8  ;;  %v236_v15 = vsub.f32 %v212_v3, %v224_v9  ;;  %v219_v29 = vld [vmem:[%s454_s20 + $0x8] sm:$0xff] }
  0x15   : > { %v238_v16 = vsub.f32 %v214_v4, %v226_v10  ;;  %v242_v17 = vand.u32 2147483647, %v230_v12  ;;  %v244_v18 = vand.u32 2147483647, %v232_v13  ;;  %v240_v20 = vsub.f32 %v216_v5, %v228_v11  ;;  %v221_v30 = vld [vmem:[%s454_s20 + $0x18] sm:$0xff]  ;;  %v223_v31 = vld [vmem:[%s454_s20 + $0x28] sm:$0xff] }
  0x16   : > { %v246_v19 = vand.u32 2147483647, %v234_v14  ;;  %v248_v24 = vand.u32 2147483647, %v236_v15  ;;  %v225_v33 = vld [vmem:[%s454_s20 + $0x38] sm:$0xff]  ;;  %v227_v34 = vld [vmem:[%s454_s20 + $0x48] sm:$0xff]  ;;  %v231_v35 = vsub.f32 %v207_v21, %v219_v29  ;;  %v233_v36 = vsub.f32 %v209_v22, %v221_v30 }
  0x17   : > { %v256_v25 = vadd.f32 %v244_v18, %v242_v17  ;;  %v250_v28 = vand.u32 2147483647, %v238_v16  ;;  %v235_v37 = vsub.f32 %v211_v23, %v223_v31  ;;  %v252_v38 = vand.u32 2147483647, %v240_v20  ;;  %v217_v39 = vld [vmem:[%s449_s17 + $0x58] sm:$0xff] }
  0x18   : > { %v229_v40 = vld [vmem:[%s454_s20 + $0x58] sm:$0xff]  ;;  %v237_v41 = vsub.f32 %v213_v26, %v225_v33  ;;  %v239_v42 = vsub.f32 %v215_v27, %v227_v34  ;;  %v243_v44 = vand.u32 2147483647, %v231_v35  ;;  %v245_v45 = vand.u32 2147483647, %v233_v36 }
  0x19   : > { %v257_v32 = vadd.f32 %v256_v25, %v246_v19  ;;  %v247_v46 = vand.u32 2147483647, %v235_v37  ;;  %v241_v48 = vsub.f32 %v217_v39, %v229_v40 }
  0x1a   : > { %v249_v49 = vand.u32 2147483647, %v237_v41  ;;  %v261_v50 = vadd.f32 %v245_v45, %v243_v44  ;;  %v251_v52 = vand.u32 2147483647, %v239_v42 }
  0x1b   : > { %v258_v43 = vadd.f32 %v257_v32, %v248_v24  ;;  %v253_v54 = vand.u32 2147483647, %v241_v48 }
  0x1c   : > { %v262_v53 = vadd.f32 %v261_v50, %v247_v46 }
  0x1d   : > { %v259_v47 = vadd.f32 %v258_v43, %v250_v28 }
  0x1e   : > { %v263_v55 = vadd.f32 %v262_v53, %v249_v49 }
  0x1f   : > { %v260_v51 = vadd.f32 %v259_v47, %v252_v38 }
  0x20   : > { %v264_v56 = vadd.f32 %v263_v55, %v251_v52 }
  0x21   : > { %268 = vst [vmem:[%s199_s24] sm:$0xff] %v260_v51 }
  0x22   : > { %v265_v57 = vadd.f32 %v264_v56, %v253_v54 }
  0x24   : > { %269 = vst [vmem:[%s199_s24 + $0x8] sm:$0xff] %v265_v57 }
  0x25 PF: > { %s12_s11 = sadd.s32 1, %s408_s11   ;;  %s499_s9 = smov %s404_s10 }
  0x26   : > { %p9_p6 = scmp.ge.s32.totalorder %s12_s11, 4   ;;  %s500_s10 = smov %s502_s12 }
  0x28   :  { %11 = sbr.rel (!%p9_p6) target bundleno = 2 (0x2), region = 65 }

</bundles_post_ra>
